<compile_context>
chip_gen: v6e
topology: v6e:2x2x1
jax: 0.10.0
libtpu: 0.0.40
codegen_flags: <defaults>
</compile_context>

<pallas_src>
import jax
import jax.numpy as jnp
from jax.experimental import pallas as pl
from jax.experimental.pallas import tpu as pltpu


# ----------------------------- kernel ---------------------------------------


def _head_kernel(x_ref, w1_ref, b1_ref, w2_ref, b2_ref, o_ref, out_acc_ref):
    # x_ref : [TB, Hp]   (resident per batch tile)
    # w1_ref: [Hp, tn]   dense weight column block
    # b1_ref: [1, tn]    dense bias slice (f32)
    # w2_ref: [tn, Lp]   out_proj weight row block
    # b2_ref: [1, Lp]    out_proj bias (f32)
    # o_ref : [TB, Lp]   output block (resident per batch tile)
    # out_acc_ref: [TB, Lp] f32 accumulator, persists across the n axis.
    n = pl.program_id(1)

    @pl.when(n == 0)
    def _():
        out_acc_ref[...] = jnp.zeros_like(out_acc_ref)

    # dense slice: [TB, Hp] @ [Hp, tn] with f32 MXU accumulation, then bias+tanh
    h = jnp.dot(x_ref[...], w1_ref[...], preferred_element_type=jnp.float32)
    h = jnp.tanh(h + b1_ref[...].astype(jnp.float32))

    # partial out_proj: [TB, tn] @ [tn, Lp], accumulated in f32
    out_acc_ref[...] += jnp.dot(h.astype(w2_ref.dtype), w2_ref[...],
                                preferred_element_type=jnp.float32)

    @pl.when(n == pl.num_programs(1) - 1)
    def _():
        o_ref[...] = (out_acc_ref[...]
                      + b2_ref[...].astype(jnp.float32)).astype(o_ref.dtype)


# ----------------------------- helpers --------------------------------------


def _round_up(x, m):
    return (x + m - 1) // m * m


def _vmem_budget_bytes():
    """Usable VMEM budget: device capacity minus ~16 MiB headroom for Mosaic."""
    cap = 64 << 20  # conservative default (v7x per-core VMEM)
    try:
        info = pltpu.get_tpu_info()
        cap = int(getattr(info, "vmem_capacity_bytes", cap))
    except Exception:
        pass
    return max(cap - (16 << 20), 32 << 20)


def _footprint_bytes(tb, tn, Hp, Lp, in_isz, out_isz):
    return (2 * tb * Hp * in_isz          # x (double-buffered per batch tile)
            + 2 * Hp * tn * in_isz        # dense weight column blocks
            + 2 * tn * 4                  # dense bias slices (f32)
            + 2 * tn * Lp * in_isz        # out_proj weight row blocks
            + 2 * Lp * 4                  # out_proj bias (f32)
            + 2 * tb * Lp * out_isz       # output block
            + tb * Lp * 4)                # f32 output accumulator scratch


def _select_tiles(B, Hp, Lp, in_isz, out_isz, budget):
    tn_candidates = [t for t in (1024, 512, 256, 128) if t <= Hp and Hp % t == 0]
    if not tn_candidates:
        tn_candidates = [Hp]

    bp8 = _round_up(max(B, 1), 8)
    tb = min(bp8, 1024)            # cover the whole batch in one tile if possible
    tn = tn_candidates[-1]
    while True:
        fits = False
        for cand in tn_candidates:
            if _footprint_bytes(tb, cand, Hp, Lp, in_isz, out_isz) <= budget:
                tn, fits = cand, True
                break
        if fits or tb <= 8:
            break
        tb = max(8, _round_up(tb // 2, 8))

    # With multiple batch tiles, split the batch evenly to minimise padding.
    n_bt = -(-bp8 // tb)
    tb = _round_up(-(-B // n_bt), 8)
    bp = tb * n_bt
    return tb, tn, bp


# ----------------------------- public API -----------------------------------


def prepare_head_params(dense_w, dense_b, out_w, out_b, *,
                        compute_dtype=jnp.bfloat16):
    """Pad weights to TPU tiles and cast MXU operands ONCE.

    Call this outside the per-step serving loop; the returned dict is reused by
    `hier_xmod_classification_head_apply` with no per-call weight copies.
    """
    H = dense_w.shape[0]
    L = out_w.shape[1]
    if compute_dtype is None:
        compute_dtype = dense_w.dtype
    Hp = _round_up(H, 128)
    Lp = _round_up(L, 128)

    w1 = dense_w.astype(compute_dtype)
    w2 = out_w.astype(compute_dtype)
    b1 = dense_b.astype(jnp.float32)
    b2 = out_b.astype(jnp.float32)
    if Hp != H:
        w1 = jnp.pad(w1, ((0, Hp - H), (0, Hp - H)))
        w2 = jnp.pad(w2, ((0, Hp - H), (0, 0)))
        b1 = jnp.pad(b1, ((0, Hp - H),))
    if Lp != L:
        w2 = jnp.pad(w2, ((0, 0), (0, Lp - L)))
        b2 = jnp.pad(b2, ((0, Lp - L),))

    return dict(w1=w1, b1=b1.reshape(1, Hp), w2=w2, b2=b2.reshape(1, Lp),
                hidden_size=H, num_labels=L, compute_dtype=compute_dtype)


def hier_xmod_classification_head_apply(features, params, *, out_dtype=None):
    """features: [B, H]; params: output of prepare_head_params."""
    B, H = features.shape
    assert H == params["hidden_size"], "hidden size mismatch"
    Hp = params["w1"].shape[0]
    Lp = params["w2"].shape[1]
    L = params["num_labels"]
    cdt = params["compute_dtype"]
    out_dtype = out_dtype if out_dtype is not None else features.dtype

    in_isz = jnp.dtype(cdt).itemsize
    out_isz = jnp.dtype(out_dtype).itemsize
    budget = _vmem_budget_bytes()
    TB, tn, Bp = _select_tiles(B, Hp, Lp, in_isz, out_isz, budget)

    x = features
    if x.dtype != cdt:
        x = x.astype(cdt)
    if (Bp != B) or (Hp != H):
        x = jnp.pad(x, ((0, Bp - B), (0, Hp - H)))

    grid = (Bp // TB, Hp // tn)
    n_bt = Bp // TB

    fp = _footprint_bytes(TB, tn, Hp, Lp, in_isz, out_isz)
    vmem_limit = int(min(max(fp + (4 << 20), 32 << 20), budget))

    cost = pl.CostEstimate(
        flops=int(2 * Bp * Hp * Hp + 2 * Bp * Hp * Lp),
        transcendentals=int(Bp * Hp),
        bytes_accessed=int(Bp * Hp * in_isz            # x
                           + n_bt * Hp * Hp * in_isz   # W1 (once per batch tile)
                           + n_bt * Hp * 4             # b1
                           + n_bt * Hp * Lp * in_isz   # W2
                           + Lp * 4                    # b2
                           + Bp * Lp * out_isz),       # out
    )

    out_p = pl.pallas_call(
        _head_kernel,
        out_shape=jax.ShapeDtypeStruct((Bp, Lp), out_dtype),
        grid_spec=pltpu.PrefetchScalarGridSpec(
            num_scalar_prefetch=0,
            grid=grid,
            in_specs=[
                pl.BlockSpec((TB, Hp), lambda i, n: (i, 0)),   # x (per batch tile)
                pl.BlockSpec((Hp, tn), lambda i, n: (0, n)),   # dense W column blk
                pl.BlockSpec((1, tn), lambda i, n: (0, n)),    # dense b slice
                pl.BlockSpec((tn, Lp), lambda i, n: (n, 0)),   # out_proj W row blk
                pl.BlockSpec((1, Lp), lambda i, n: (0, 0)),    # out_proj b
            ],
            out_specs=pl.BlockSpec((TB, Lp), lambda i, n: (i, 0)),
            scratch_shapes=[pltpu.VMEM((TB, Lp), jnp.float32)],
        ),
        compiler_params=pltpu.CompilerParams(
            dimension_semantics=("parallel", "arbitrary"),
            vmem_limit_bytes=vmem_limit,
        ),
        cost_estimate=cost,
    )(x, params["w1"], params["b1"], params["w2"], params["b2"])

    return out_p[:B, :L]


def hier_xmod_classification_head(features, dense_w, dense_b, out_w, out_b, *,
                                  compute_dtype=jnp.bfloat16, out_dtype=None):
    """One-shot convenience wrapper (prepares params then applies).

    For serving, call prepare_head_params once and reuse it with
    hier_xmod_classification_head_apply to avoid per-call weight pad/cast.
    """
    params = prepare_head_params(dense_w, dense_b, out_w, out_b,
                                 compute_dtype=compute_dtype)
    return hier_xmod_classification_head_apply(features, params,
                                               out_dtype=out_dtype)


# ----------------------------- test harness ---------------------------------


def _init_params(key, hidden_size, num_labels, dtype=jnp.float32):
    """Deterministic PyTorch-Linear-style init: U(-1/sqrt(fan_in), 1/sqrt(fan_in))."""
    k1, k2, k3, k4 = jax.random.split(key, 4)
    bound = 1.0 / (hidden_size ** 0.5)
    dense_w = jax.random.uniform(k1, (hidden_size, hidden_size), dtype,
                                 minval=-bound, maxval=bound)
    dense_b = jax.random.uniform(k2, (hidden_size,), dtype,
                                 minval=-bound, maxval=bound)
    out_w = jax.random.uniform(k3, (hidden_size, num_labels), dtype,
                               minval=-bound, maxval=bound)
    out_b = jax.random.uniform(k4, (num_labels,), dtype,
                               minval=-bound, maxval=bound)
    return dense_w, dense_b, out_w, out_b


def _reference(x, w1, b1, w2, b2):
    h = jnp.tanh(jnp.dot(x, w1, preferred_element_type=jnp.float32,
                         precision=jax.lax.Precision.HIGHEST) + b1)
    return jnp.dot(h, w2, preferred_element_type=jnp.float32,
                   precision=jax.lax.Precision.HIGHEST) + b2


if __name__ == "__main__":
    key = jax.random.PRNGKey(0)

    # --- check 1: tiny module-sized shapes (single grid step, heavy padding) --
    B, H, L = 2, 32, 4
    k_x, k_p, key = jax.random.split(key, 3)
    features = jax.random.normal(k_x, (B, H), jnp.float32)
    dense_w, dense_b, out_w, out_b = _init_params(k_p, H, L)
    ref = _reference(features, dense_w, dense_b, out_w, out_b)

    # f32 compute path: tight tolerance proves kernel math is exact.
    out_f32 = hier_xmod_classification_head(features, dense_w, dense_b,
                                            out_w, out_b,
                                            compute_dtype=jnp.float32)
    out_f32 = jax.block_until_ready(out_f32)
    assert out_f32.shape == (B, L)
    assert jnp.allclose(out_f32, ref, atol=1e-4, rtol=1e-4)

    # default bf16 compute path: dtype-aware (looser) tolerance.
    out_bf16 = hier_xmod_classification_head(features, dense_w, dense_b,
                                             out_w, out_b)
    out_bf16 = jax.block_until_ready(out_bf16)
    assert out_bf16.shape == (B, L)
    assert jnp.allclose(out_bf16, ref, atol=5e-2, rtol=5e-2)

    # --- check 2: unaligned shapes, multiple hidden-slice grid steps, and the
    # prepare-once / apply-many serving pattern (no per-call weight copies). ---
    B2, H2, L2 = 10, 300, 7
    k_x2, k_p2 = jax.random.split(key)
    features2 = jax.random.normal(k_x2, (B2, H2), jnp.float32)
    dw2, db2, ow2, ob2 = _init_params(k_p2, H2, L2)

    params2 = prepare_head_params(dw2, db2, ow2, ob2, compute_dtype=jnp.float32)
    out2 = jax.block_until_ready(
        hier_xmod_classification_head_apply(features2, params2))
    ref2 = _reference(features2, dw2, db2, ow2, ob2)
    assert out2.shape == (B2, L2)
    assert jnp.allclose(out2, ref2, atol=1e-4, rtol=1e-4)

    print("KERNEL_OK")
</pallas_src>

<mosaic_0001>
module attributes {stable_mosaic.version = 11 : i64} {
  func.func @_head_kernel(%arg0: i32, %arg1: i32, %arg2: memref<8x128xf32, #tpu.memory_space<vmem>>, %arg3: memref<128x128xf32, #tpu.memory_space<vmem>>, %arg4: memref<1x128xf32, #tpu.memory_space<vmem>>, %arg5: memref<128x128xf32, #tpu.memory_space<vmem>>, %arg6: memref<1x128xf32, #tpu.memory_space<vmem>>, %arg7: memref<8x128xf32, #tpu.memory_space<vmem>>, %arg8: memref<8x128xf32, #tpu.memory_space<vmem>>) attributes {dimension_semantics = [#tpu.dimension_semantics<parallel>, #tpu.dimension_semantics<arbitrary>], iteration_bounds = array<i64: 1, 1>, scalar_prefetch = 0 : i64, scratch_operands = 1 : i64, tpu.core_type = #tpu.core_type<tc>, window_params = [{transform_indices = @transform_0, window_bounds = array<i64: 8, 128>}, {transform_indices = @transform_1, window_bounds = array<i64: 128, 128>}, {transform_indices = @transform_2, window_bounds = array<i64: 1, 128>}, {transform_indices = @transform_3, window_bounds = array<i64: 128, 128>}, {pipeline_mode = #tpu.pipeline_mode<synchronous>, transform_indices = @transform_4, window_bounds = array<i64: 1, 128>}, {transform_indices = @transform_5, window_bounds = array<i64: 8, 128>}]} {
    %c0_i32 = arith.constant 0 : i32
    %0 = arith.cmpi eq, %arg1, %c0_i32 : i32
    %1 = arith.extui %0 : i1 to i32
    %c0_i32_0 = arith.constant 0 : i32
    %2 = arith.cmpi ne, %1, %c0_i32_0 : i32
    scf.if %2 {
      %cst_15 = arith.constant 0.000000e+00 : f32
      %18 = vector.broadcast %cst_15 : f32 to vector<8x128xf32>
      %c0_16 = arith.constant 0 : index
      %c0_17 = arith.constant 0 : index
      %19 = vector.load %arg8[%c0_16, %c0_17] : memref<8x128xf32, #tpu.memory_space<vmem>>, vector<8x128xf32>
      tpu.vector_store %arg8[%c0_16, %c0_17], %18 {strides = array<i32>} : memref<8x128xf32, #tpu.memory_space<vmem>>, vector<8x128xf32>,
    } else {
    }
    %c0 = arith.constant 0 : index
    %c0_1 = arith.constant 0 : index
    %3 = vector.load %arg2[%c0, %c0_1] : memref<8x128xf32, #tpu.memory_space<vmem>>, vector<8x128xf32>
    %c0_2 = arith.constant 0 : index
    %c0_3 = arith.constant 0 : index
    %4 = vector.load %arg3[%c0_2, %c0_3] : memref<128x128xf32, #tpu.memory_space<vmem>>, vector<128x128xf32>
    %cst = arith.constant dense<0.000000e+00> : vector<8x128xf32>
    %5 = tpu.matmul %3, %4, %cst {dimension_numbers = #tpu.dot_dimension_numbers<[1], [0], [0], [1], [0, 0, 1, 1], [], []>} : vector<8x128xf32>, vector<128x128xf32>, vector<8x128xf32> -> vector<8x128xf32>
    %c0_4 = arith.constant 0 : index
    %c0_5 = arith.constant 0 : index
    %6 = vector.load %arg4[%c0_4, %c0_5] : memref<1x128xf32, #tpu.memory_space<vmem>>, vector<1x128xf32>
    %7 = vector.broadcast %6 : vector<1x128xf32> to vector<8x128xf32>
    %8 = arith.addf %5, %7 : vector<8x128xf32>
    %9 = math.tanh %8 : vector<8x128xf32>
    %c0_6 = arith.constant 0 : index
    %c0_7 = arith.constant 0 : index
    %10 = vector.load %arg8[%c0_6, %c0_7] : memref<8x128xf32, #tpu.memory_space<vmem>>, vector<8x128xf32>
    %c0_8 = arith.constant 0 : index
    %c0_9 = arith.constant 0 : index
    %11 = vector.load %arg5[%c0_8, %c0_9] : memref<128x128xf32, #tpu.memory_space<vmem>>, vector<128x128xf32>
    %cst_10 = arith.constant dense<0.000000e+00> : vector<8x128xf32>
    %12 = tpu.matmul %9, %11, %cst_10 {dimension_numbers = #tpu.dot_dimension_numbers<[1], [0], [0], [1], [0, 0, 1, 1], [], []>} : vector<8x128xf32>, vector<128x128xf32>, vector<8x128xf32> -> vector<8x128xf32>
    %13 = arith.addf %10, %12 : vector<8x128xf32>
    %c0_11 = arith.constant 0 : index
    %c0_12 = arith.constant 0 : index
    %14 = vector.load %arg8[%c0_11, %c0_12] : memref<8x128xf32, #tpu.memory_space<vmem>>, vector<8x128xf32>
    tpu.vector_store %arg8[%c0_11, %c0_12], %13 {strides = array<i32>} : memref<8x128xf32, #tpu.memory_space<vmem>>, vector<8x128xf32>,
    %c0_i32_13 = arith.constant 0 : i32
    %15 = arith.cmpi eq, %arg1, %c0_i32_13 : i32
    %16 = arith.extui %15 : i1 to i32
    %c0_i32_14 = arith.constant 0 : i32
    %17 = arith.cmpi ne, %16, %c0_i32_14 : i32
    scf.if %17 {
      %c0_15 = arith.constant 0 : index
      %c0_16 = arith.constant 0 : index
      %18 = vector.load %arg8[%c0_15, %c0_16] : memref<8x128xf32, #tpu.memory_space<vmem>>, vector<8x128xf32>
      %c0_17 = arith.constant 0 : index
      %c0_18 = arith.constant 0 : index
      %19 = vector.load %arg6[%c0_17, %c0_18] : memref<1x128xf32, #tpu.memory_space<vmem>>, vector<1x128xf32>
      %20 = vector.broadcast %19 : vector<1x128xf32> to vector<8x128xf32>
      %21 = arith.addf %18, %20 : vector<8x128xf32>
      %c0_19 = arith.constant 0 : index
      %c0_20 = arith.constant 0 : index
      %22 = vector.load %arg7[%c0_19, %c0_20] : memref<8x128xf32, #tpu.memory_space<vmem>>, vector<8x128xf32>
      tpu.vector_store %arg7[%c0_19, %c0_20], %21 {strides = array<i32>} : memref<8x128xf32, #tpu.memory_space<vmem>>, vector<8x128xf32>,
    } else {
    }
    return
  }
  func.func @transform_0(%arg0: i32, %arg1: i32) -> (i32, i32) {
    %c0_i32 = arith.constant 0 : i32
    %c0_i32_0 = arith.constant 0 : i32
    return %arg0, %c0_i32 : i32, i32
  }
  func.func @transform_1(%arg0: i32, %arg1: i32) -> (i32, i32) {
    %c0_i32 = arith.constant 0 : i32
    %c0_i32_0 = arith.constant 0 : i32
    return %c0_i32, %arg1 : i32, i32
  }
  func.func @transform_2(%arg0: i32, %arg1: i32) -> (i32, i32) {
    %c0_i32 = arith.constant 0 : i32
    %c0_i32_0 = arith.constant 0 : i32
    return %c0_i32, %arg1 : i32, i32
  }
  func.func @transform_3(%arg0: i32, %arg1: i32) -> (i32, i32) {
    %c0_i32 = arith.constant 0 : i32
    %c0_i32_0 = arith.constant 0 : i32
    return %arg1, %c0_i32 : i32, i32
  }
  func.func @transform_4(%arg0: i32, %arg1: i32) -> (i32, i32) {
    %c0_i32 = arith.constant 0 : i32
    %c0_i32_0 = arith.constant 0 : i32
    %c0_i32_1 = arith.constant 0 : i32
    return %c0_i32, %c0_i32_0 : i32, i32
  }
  func.func @transform_5(%arg0: i32, %arg1: i32) -> (i32, i32) {
    %c0_i32 = arith.constant 0 : i32
    %c0_i32_0 = arith.constant 0 : i32
    return %arg0, %c0_i32 : i32, i32
  }
}

</mosaic_0001>

<bundles_post_ra>
// kernel: tpu_custom_call.1
= control target key start
LH: loop header
LB: loop body
LE: loop exit
PB: predicated region body
PF: predicated region fallthrough
CT: control target
= control target key end

     0   :  { %10 = vsyncpa [#allocation4], 0  ;;  %s570_s0 = inlined_call_operand.hbm [shape: f32[8,128], index: 0, kind: input, shape index: {}]   ;;  %s571_s1 = inlined_call_operand.hbm [shape: f32[128,128], index: 1, kind: input, shape index: {}]   ;;  %s572_s2 = inlined_call_operand.vmem [shape: f32[1,128], index: 2, kind: input, shape index: {}]   ;;  %s573_s3 = inlined_call_operand.hbm [shape: f32[128,128], index: 3, kind: input, shape index: {}]   ;;  %s574_s4 = inlined_call_operand.vmem [shape: f32[1,128], index: 4, kind: input, shape index: {}]   ;;  %s575_s5 = inlined_call_operand.hbm [shape: f32[8,128], index: 5, kind: output, shape index: {}]  }
   0x1   :  { %11 = vsyncpa [#allocation7], 0 }
   0x2   :  { %12 = vsyncpa [#allocation5], 0  ;;  %s480_s18 = smov [#allocation6]  }
   0x3   :  { %s28_s19 = sshll.u32 %s480_s18, 4  ;;  %s29_s19 = int_to_ptr.vmem [resolvable:$true] %s28_s19 }
   0x4   :  { %s402_s20 = scalar_lea.vmem %s29_s19, 2048  ;;  %p407_p1 = scmp.lt.s32.totalorder %s29_s19, %s29_s19 }
   0x5   :  { %p403_p0 = scmp.ne.s32.totalorder %s29_s19, %s402_s20  ;;  %p408_p2 = scmp.lt.s32.totalorder %s402_s20, %s402_s20 }
   0x7   :  { %p409_p3 = por %p408_p2, %p407_p1 }
   0x9   :  { %p410_p4 = pnand %p409_p3, %p403_p0 }
   0xb   :  { %413 = shalt.err (!%p410_p4)
}
   0xc   :  { %s481_s21 = smov 128   ;;  %s482_s22 = smov 8  }
   0xd   :  { %34 = dma.hbm_to_vmem [thread:$0]  %s571_s1, 2048, %s29_s19, [#allocation7], %s481_s21, %s481_s21, %s482_s22  }
   0xe   :  { %s483_s25 = smov [#allocation3]   ;;  %s484_s27 = smov [#allocation8]  }
   0xf   :  { %s19_s26 = sshll.u32 %s483_s25, 4  ;;  %s42_s28 = sshll.u32 %s484_s27, 4  ;;  %s20_s26 = int_to_ptr.vmem [resolvable:$true] %s19_s26  ;;  %s43_s28 = int_to_ptr.vmem [resolvable:$true] %s42_s28 }
  0x10   :  { %s422_s29 = scalar_lea.vmem %s20_s26, 128  ;;  %p427_p6 = scmp.lt.s32.totalorder %s20_s26, %s20_s26 }
  0x11   :  { %p423_p5 = scmp.ne.s32.totalorder %s20_s26, %s422_s29  ;;  %p428_p7 = scmp.lt.s32.totalorder %s422_s29, %s422_s29 }
  0x13   :  { %p429_p8 = por %p428_p7, %p427_p6 }
  0x15   :  { %p430_p9 = pnand %p429_p8, %p423_p5 }
  0x17   :  { %433 = shalt.err (!%p430_p9)
}
  0x18   :  { %22 = dma.hbm_to_vmem [thread:$0]  %s570_s0, 128, %s20_s26, [#allocation4]  }
  0x19   :  { %s442_s7 = scalar_lea.vmem %s43_s28, 2048  ;;  %p447_p11 = scmp.lt.s32.totalorder %s43_s28, %s43_s28 }
  0x1a   :  { %p443_p10 = scmp.ne.s32.totalorder %s43_s28, %s442_s7  ;;  %p448_p12 = scmp.lt.s32.totalorder %s442_s7, %s442_s7 }
  0x1c   :  { %p449_p13 = por %p448_p12, %p447_p11 }
  0x1e   :  { %p450_p0 = pnand %p449_p13, %p443_p10 }
  0x20   :  { %453 = shalt.err (!%p450_p0)
}
  0x21   :  { %48 = dma.hbm_to_vmem [thread:$0]  %s573_s3, 2048, %s43_s28, [#allocation7], %s481_s21, %s481_s21, %s482_s22  }
  0x22   :  { %474 = dma.done.wait [#allocation4], 128  }
  0x23   :  { %475 = vsyncadd [#allocation4], 4294967168 }
  0x24   :  { %476 = dma.done.wait [#allocation7], 4096  }
  0x25   :  { %477 = vsyncadd [#allocation7], 4294963200  ;;  %v485_v0 = vmov 0.0   ;;  %vm486_vm0 = vmmov 0   ;;  %v81_v1 = vld [vmem:[#allocation6 + $0x78] sm:$0xff]  ;;  %v80_v2 = vld [vmem:[#allocation6 + $0x70] sm:$0xff] }
  0x26   :  { %314 = vmatprep.subr.mxu0 %v485_v0  ;;  %346 = vmatprep.mubr.msk.f32.mxu0 %vm486_vm0, %v485_v0  ;;  %v79_v3 = vld [vmem:[#allocation6 + $0x68] sm:$0xff]  ;;  %v78_v4 = vld [vmem:[#allocation6 + $0x60] sm:$0xff]  ;;  %v176_v5 = vld [vmem:[#allocation8 + $0x78] sm:$0xff]  ;;  %s487_s11 = smov [#allocation9]  }
  0x27   :  { %349 = vmatprep.subr.mxu1 %v485_v0  ;;  %381 = vmatprep.mubr.msk.f32.mxu1 %vm486_vm0, %v485_v0  ;;  %v77_v6 = vld [vmem:[#allocation6 + $0x58] sm:$0xff]  ;;  %v175_v7 = vld [vmem:[#allocation8 + $0x70] sm:$0xff]  ;;  %v174_v8 = vld [vmem:[#allocation8 + $0x68] sm:$0xff]  ;;  %s268_s12 = sshll.u32 %s487_s11, 4  ;;  %s269_s12 = int_to_ptr.vmem [resolvable:$true] %s268_s12 }
  0x28   :  { %315 = vmatpush3.msra.mxu0 %v81_v1  ;;  %350 = vmatpush3.msra.mxu1 %v176_v5  ;;  %v76_v9 = vld [vmem:[#allocation6 + $0x50] sm:$0xff]  ;;  %v173_v10 = vld [vmem:[#allocation8 + $0x60] sm:$0xff]  ;;  %v75_v11 = vld [vmem:[#allocation6 + $0x48] sm:$0xff]  ;;  %s454_s13 = scalar_lea.vmem %s269_s12, 128  ;;  %p459_p2 = scmp.lt.s32.totalorder %s269_s12, %s269_s12 }
  0x29   :  { %316 = vmatprep.subr.mxu0 %v485_v0  ;;  %351 = vmatprep.subr.mxu1 %v485_v0  ;;  %v172_v12 = vld [vmem:[#allocation8 + $0x58] sm:$0xff]  ;;  %v74_v13 = vld [vmem:[#allocation6 + $0x40] sm:$0xff]  ;;  %v171_v14 = vld [vmem:[#allocation8 + $0x50] sm:$0xff]  ;;  %p455_p1 = scmp.ne.s32.totalorder %s269_s12, %s454_s13  ;;  %p460_p3 = scmp.lt.s32.totalorder %s454_s13, %s454_s13 }
  0x2a   :  { %317 = vmatpush3.msra.mxu0 %v80_v2  ;;  %352 = vmatpush3.msra.mxu1 %v175_v7  ;;  %v73_v15 = vld [vmem:[#allocation6 + $0x38] sm:$0xff]  ;;  %v170_v16 = vld [vmem:[#allocation8 + $0x48] sm:$0xff]  ;;  %v72_v17 = vld [vmem:[#allocation6 + $0x30] sm:$0xff] }
  0x2b   :  { %318 = vmatprep.subr.mxu0 %v485_v0  ;;  %353 = vmatprep.subr.mxu1 %v485_v0  ;;  %v71_v18 = vld [vmem:[#allocation6 + $0x28] sm:$0xff]  ;;  %v70_v19 = vld [vmem:[#allocation6 + $0x20] sm:$0xff]  ;;  %v69_v20 = vld [vmem:[#allocation6 + $0x18] sm:$0xff]  ;;  %p461_p4 = por %p460_p3, %p459_p2 }
  0x2c   :  { %319 = vmatpush3.msra.mxu0 %v79_v3  ;;  %354 = vmatpush3.msra.mxu1 %v174_v8  ;;  %v68_v21 = vld [vmem:[#allocation6 + $0x10] sm:$0xff]  ;;  %v67_v22 = vld [vmem:[#allocation6 + $0x8] sm:$0xff]  ;;  %v66_v23 = vld [vmem:[#allocation6] sm:$0xff] }
  0x2d   :  { %320 = vmatprep.subr.mxu0 %v485_v0  ;;  %355 = vmatprep.subr.mxu1 %v485_v0  ;;  %v65_v24 = vld [vmem:[#allocation3] sm:$0xff]  ;;  %v169_v25 = vld [vmem:[#allocation8 + $0x40] sm:$0xff]  ;;  %v167_v27 = vld [vmem:[#allocation8 + $0x30] sm:$0xff]  ;;  %p462_p5 = pnand %p461_p4, %p455_p1 }
  0x2e   :  { %321 = vmatpush3.msra.mxu0 %v78_v4  ;;  %356 = vmatpush3.msra.mxu1 %v173_v10  ;;  %v168_v26 = vld [vmem:[#allocation8 + $0x38] sm:$0xff]  ;;  %v166_v28 = vld [vmem:[#allocation8 + $0x28] sm:$0xff]  ;;  %v165_v29 = vld [vmem:[#allocation8 + $0x20] sm:$0xff] }
  0x2f   :  { %322 = vmatprep.subr.mxu0 %v485_v0  ;;  %357 = vmatprep.subr.mxu1 %v485_v0  ;;  %v164_v30 = vld [vmem:[#allocation8 + $0x18] sm:$0xff]  ;;  %v163_v31 = vld [vmem:[#allocation8 + $0x10] sm:$0xff]  ;;  %v162_v32 = vld [vmem:[#allocation8 + $0x8] sm:$0xff] }
  0x30   :  { %323 = vmatpush3.msra.mxu0 %v77_v6  ;;  %358 = vmatpush3.msra.mxu1 %v172_v12  ;;  %v161_v33 = vld [vmem:[#allocation8] sm:$0xff]  ;;  %v278_v34 = vld [vmem:[%s572_s2] ss:$0 sm:$0xff] }
  0x31   :  { %324 = vmatprep.subr.mxu0 %v485_v0  ;;  %359 = vmatprep.subr.mxu1 %v485_v0  ;;  %v279_v39 = vld [vmem:[%s574_s4] ss:$0 sm:$0xff] }
  0x32   :  { %325 = vmatpush3.msra.mxu0 %v76_v9  ;;  %360 = vmatpush3.msra.mxu1 %v171_v14 }
  0x33   :  { %326 = vmatprep.subr.mxu0 %v485_v0  ;;  %361 = vmatprep.subr.mxu1 %v485_v0 }
  0x34   :  { %327 = vmatpush3.msra.mxu0 %v75_v11  ;;  %362 = vmatpush3.msra.mxu1 %v170_v16 }
  0x35   :  { %328 = vmatprep.subr.mxu0 %v485_v0  ;;  %363 = vmatprep.subr.mxu1 %v485_v0 }
  0x36   :  { %329 = vmatpush3.msra.mxu0 %v74_v13  ;;  %364 = vmatpush3.msra.mxu1 %v169_v25 }
  0x37   :  { %330 = vmatprep.subr.mxu0 %v485_v0  ;;  %365 = vmatprep.subr.mxu1 %v485_v0 }
  0x38   :  { %331 = vmatpush3.msra.mxu0 %v73_v15  ;;  %366 = vmatpush3.msra.mxu1 %v168_v26 }
  0x39   :  { %332 = vmatprep.subr.mxu0 %v485_v0  ;;  %367 = vmatprep.subr.mxu1 %v485_v0 }
  0x3a   :  { %333 = vmatpush3.msra.mxu0 %v72_v17  ;;  %368 = vmatpush3.msra.mxu1 %v167_v27 }
  0x3b   :  { %334 = vmatprep.subr.mxu0 %v485_v0  ;;  %369 = vmatprep.subr.mxu1 %v485_v0 }
  0x3c   :  { %335 = vmatpush3.msra.mxu0 %v71_v18  ;;  %370 = vmatpush3.msra.mxu1 %v166_v28 }
  0x3d   :  { %336 = vmatprep.subr.mxu0 %v485_v0  ;;  %371 = vmatprep.subr.mxu1 %v485_v0 }
  0x3e   :  { %337 = vmatpush3.msra.mxu0 %v70_v19  ;;  %372 = vmatpush3.msra.mxu1 %v165_v29 }
  0x3f   :  { %338 = vmatprep.subr.mxu0 %v485_v0  ;;  %373 = vmatprep.subr.mxu1 %v485_v0 }
  0x40   :  { %339 = vmatpush3.msra.mxu0 %v69_v20  ;;  %374 = vmatpush3.msra.mxu1 %v164_v30 }
  0x41   :  { %340 = vmatprep.subr.mxu0 %v485_v0  ;;  %375 = vmatprep.subr.mxu1 %v485_v0 }
  0x42   :  { %341 = vmatpush3.msra.mxu0 %v68_v21  ;;  %376 = vmatpush3.msra.mxu1 %v163_v31 }
  0x43   :  { %342 = vmatprep.subr.mxu0 %v485_v0  ;;  %377 = vmatprep.subr.mxu1 %v485_v0 }
  0x44   :  { %343 = vmatpush3.msra.mxu0 %v67_v22  ;;  %378 = vmatpush3.msra.mxu1 %v162_v32 }
  0x45   :  { %344 = vmatprep.subr.mxu0 %v485_v0  ;;  %379 = vmatprep.subr.mxu1 %v485_v0 }
  0x46   :  { %345 = vmatpush3.msra.mxu0 %v66_v23  ;;  %380 = vmatpush3.msra.mxu1 %v161_v33 }
  0x47   :  { %347 = vmatmul.mubr.f32.vlgmr.msra.gmra.mxu0 %v65_v24 }
 0x107   :  { %v155_v35 = vpop.f32.mrf.mxu0 }
 0x108   :  { %v156_v36 = vadd.f32 %v278_v34, %v155_v35 }
 0x109   :  { %v348_v37 = vpop.f32.mrf.mxu0 }
 0x10a   :  { %392 = vtanh.f32 %v156_v36 }
 0x117   :  { %v393_v38 = vpop.eup %392 }
 0x118   :  { %382 = vmatmul.mubr.f32.vlgmr.msra.gmra.mxu1 %v393_v38 }
 0x1d8   :  { %v243_v40 = vpop.f32.mrf.mxu1 }
 0x1d9   :  { %v260_v41 = vadd.f32 %v279_v39, %v243_v40 }
 0x1da   :  { %v383_v42 = vpop.f32.mrf.mxu1 }
 0x1db   :  { %261 = vst [vmem:[#allocation9] sm:$0xff] %v260_v41 }
 0x1dc   :  { %465 = shalt.err (!%p462_p5)
}
 0x1dd   :  { %271 = dma.vmem_to_hbm [thread:$0]  %s269_s12, 128, %s575_s5, [#allocation5]  }
 0x1de   :  { %478 = dma.done.wait [#allocation5], 128  }
 0x1df   :  { %479 = vsyncadd [#allocation5], 4294967168 }
 0x1e0   :  { %275 = vsyncpa [#allocation4], 1 }
 0x1e1   :  { %276 = vsyncpa [#allocation7], 1 }
 0x1e2   :  { %277 = vsyncpa [#allocation5], 1 }

</bundles_post_ra>
